<compile_context>
chip_gen: v7x
topology: tpu7x:2x2x1
jax: 0.10.0
libtpu: 0.0.40
codegen_flags: <defaults>
</compile_context>

<pallas_src>
import math

import jax
import jax.numpy as jnp
from jax.experimental import pallas as pl
from jax.experimental.pallas import tpu as pltpu


_TM_CAP = 512                      # M-tile for the fused matmul
_ROW_TILE = 1024                   # row tile for elementwise kernels
_VMEM_LIMIT = 48 * 1024 * 1024     # scoped-VMEM headroom (v7x-safe)


# ----------------------------------------------------------------------------
# Fused matmul kernel:  act((pre(X) @ W) * scale + bias)   (bf16 MXU, f32 acc)
# `pre` is an optional fused BN+PReLU prologue applied to X before the matmul.
# ----------------------------------------------------------------------------
def _make_mm_kernel(act, has_pre):
    def kernel(*refs):
        if has_pre:
            (x_ref, w_ref, s_ref, b_ref, a_ref,
             ps_ref, pb_ref, pa_ref, o_ref) = refs
        else:
            x_ref, w_ref, s_ref, b_ref, a_ref, o_ref = refs
        x = x_ref[...]
        if has_pre:
            xf = x.astype(jnp.float32) * ps_ref[...] + pb_ref[...]
            x = jnp.where(xf > 0, xf, pa_ref[...] * xf)
        x = x.astype(jnp.bfloat16)
        y = jnp.dot(x, w_ref[...], preferred_element_type=jnp.float32)
        y = y * s_ref[...] + b_ref[...]
        if act == "prelu":
            y = jnp.where(y > 0, y, a_ref[...] * y)
        o_ref[...] = y.astype(o_ref.dtype)
    return kernel


def fused_matmul(x, p, pre=None, out_dtype=jnp.bfloat16):
    """x: (M, K); p['wm']: (K, N) bf16; scale/bias/alpha: (1, N) f32."""
    M, K = x.shape
    N = p["wm"].shape[1]
    tm = M if M <= _TM_CAP else _TM_CAP

    def const(shape):
        return pl.BlockSpec(shape, lambda i: (0, 0))

    in_specs = [pl.BlockSpec((tm, K), lambda i: (i, 0)),
                const((K, N)), const((1, N)), const((1, N)), const((1, N))]
    args = [x, p["wm"], p["scale"], p["bias"], p["alpha"]]
    if pre is not None:
        in_specs += [const((1, K)), const((1, K)), const((1, K))]
        args += [pre["scale"], pre["bias"], pre["alpha"]]

    out = pl.pallas_call(
        _make_mm_kernel(p["act"], pre is not None),
        out_shape=jax.ShapeDtypeStruct((M, N), out_dtype),
        grid=(pl.cdiv(M, tm),),
        in_specs=in_specs,
        out_specs=pl.BlockSpec((tm, N), lambda i: (i, 0)),
        compiler_params=pltpu.CompilerParams(
            dimension_semantics=("parallel",),
            vmem_limit_bytes=_VMEM_LIMIT),
    )(*args)
    return out


def conv1x1(x, p, pre=None, out_dtype=jnp.bfloat16):
    B, H, W, C = x.shape
    y = fused_matmul(x.reshape(B * H * W, C), p, pre=pre, out_dtype=out_dtype)
    return y.reshape(B, H, W, -1)


# ----------------------------------------------------------------------------
# Strided conv (backbone stand-in only): im2col (bf16) + fused matmul.
# ----------------------------------------------------------------------------
def _im2col(x, k, stride, padding, dilation):
    B, H, W, C = x.shape
    Ho = (H + 2 * padding - dilation * (k - 1) - 1) // stride + 1
    Wo = (W + 2 * padding - dilation * (k - 1) - 1) // stride + 1
    xp = jnp.pad(x, ((0, 0), (padding, padding), (padding, padding), (0, 0)))
    cols = []
    for i in range(k):
        for j in range(k):
            patch = xp[:,
                       i * dilation:i * dilation + (Ho - 1) * stride + 1:stride,
                       j * dilation:j * dilation + (Wo - 1) * stride + 1:stride,
                       :]
            cols.append(patch)
    cols = jnp.concatenate(cols, axis=-1)
    return cols.reshape(B * Ho * Wo, k * k * C), (B, Ho, Wo)


def conv_strided(x, p, *, k=3, stride=2, padding=1, dilation=1):
    cols, (B, Ho, Wo) = _im2col(x.astype(jnp.bfloat16), k, stride, padding,
                                dilation)
    y = fused_matmul(cols, p)
    return y.reshape(B, Ho, Wo, -1)


# ----------------------------------------------------------------------------
# Direct (no-im2col) stride-1 k x k conv: gridded tap kernel.
# Grid = (B, H // tr).  Per batch the padded image is flattened to
# (Hp*Wp, C); tap (i, j) is the constant row offset i*d*Wp + j*d, so the conv
# is k*k shifted (tr*Wp, Cin) x (Cin, Cout) bf16 matmuls accumulated in f32.
# Only the 2*pad bleed columns per row are over-computed; valid rows are
# stored directly into a (B, H, W, Cout) bf16 output (no XLA epilogue).
# ----------------------------------------------------------------------------
def _make_tap_conv_kernel(k, dilation, Wp, W, tr, act):
    nrows = tr * Wp

    def kernel(x_ref, w_ref, s_ref, b_ref, a_ref, o_ref):
        row0 = pl.program_id(1) * nrows
        acc = None
        t = 0
        for i in range(k):
            for j in range(k):
                off = i * dilation * Wp + j * dilation
                xt = x_ref[pl.ds(row0 + off, nrows), :].astype(jnp.bfloat16)
                c = jnp.dot(xt, w_ref[t], preferred_element_type=jnp.float32)
                acc = c if acc is None else acc + c
                t += 1
        y = acc * s_ref[...] + b_ref[...]
        if act == "prelu":
            y = jnp.where(y > 0, y, a_ref[...] * y)
        # Store only the W valid columns of each of the tr output rows.
        for r in range(tr):
            o_ref[r] = y[r * Wp:r * Wp + W, :].astype(o_ref.dtype)
    return kernel


def _row_tile(h, cap=16):
    for t in range(min(h, cap), 0, -1):
        if h % t == 0:
            return t
    return 1


def conv_s1(x, p, *, k=3, dilation=1, out_dtype=jnp.bfloat16):
    """Stride-1 'same' conv (padding = dilation * (k - 1) // 2)."""
    B, H, W, C = x.shape
    pad = dilation * (k - 1) // 2
    Cout = p["wm"].shape[1]
    Wp = W + 2 * pad
    Hp = H + 2 * pad + 1          # +1 cushion row: bleed reads of garbage
    #                               columns in the last row block stay in
    #                               bounds without a runtime check.
    xp = jnp.pad(x.astype(jnp.bfloat16),
                 ((0, 0), (pad, pad + 1), (pad, pad), (0, 0)))
    xf = xp.reshape(B, Hp * Wp, C)
    w3 = p["wm"].reshape(k * k, C, Cout)     # free reshape of prepped matrix
    tr = _row_tile(H)
    out = pl.pallas_call(
        _make_tap_conv_kernel(k, dilation, Wp, W, tr, p["act"]),
        out_shape=jax.ShapeDtypeStruct((B, H, W, Cout), out_dtype),
        grid=(B, H // tr),
        in_specs=[
            pl.BlockSpec((None, Hp * Wp, C), lambda b, r: (b, 0, 0)),
            pl.BlockSpec((k * k, C, Cout), lambda b, r: (0, 0, 0)),
            pl.BlockSpec((1, Cout), lambda b, r: (0, 0)),
            pl.BlockSpec((1, Cout), lambda b, r: (0, 0)),
            pl.BlockSpec((1, Cout), lambda b, r: (0, 0)),
        ],
        out_specs=pl.BlockSpec((None, tr, W, Cout), lambda b, r: (b, r, 0, 0)),
        compiler_params=pltpu.CompilerParams(
            dimension_semantics=("parallel", "parallel"),
            vmem_limit_bytes=_VMEM_LIMIT),
    )(xf, w3, p["scale"], p["bias"], p["alpha"])
    return out


# ----------------------------------------------------------------------------
# Blocked elementwise kernels (bf16 outputs, f32 compute)
# ----------------------------------------------------------------------------
def _bn_prelu_kernel(x_ref, s_ref, b_ref, a_ref, o_ref):
    y = x_ref[...].astype(jnp.float32) * s_ref[...] + b_ref[...]
    o_ref[...] = jnp.where(y > 0, y, a_ref[...] * y).astype(o_ref.dtype)


def bn_prelu(x, p):
    B, H, W, C = x.shape
    M = B * H * W
    tr = M if M <= _ROW_TILE else _ROW_TILE
    out = pl.pallas_call(
        _bn_prelu_kernel,
        out_shape=jax.ShapeDtypeStruct((M, C), jnp.bfloat16),
        grid=(pl.cdiv(M, tr),),
        in_specs=[pl.BlockSpec((tr, C), lambda i: (i, 0)),
                  pl.BlockSpec((1, C), lambda i: (0, 0)),
                  pl.BlockSpec((1, C), lambda i: (0, 0)),
                  pl.BlockSpec((1, C), lambda i: (0, 0))],
        out_specs=pl.BlockSpec((tr, C), lambda i: (i, 0)),
        compiler_params=pltpu.CompilerParams(
            dimension_semantics=("parallel",)),
    )(x.reshape(M, C), p["scale"], p["bias"], p["alpha"])
    return out.reshape(B, H, W, C)


def _rev_attn_kernel(dec_ref, aa_ref, cfp_ref, o_ref):
    # (-1 * sigmoid(decoder) + 1) * (aa_kernel_out + cfp_out)
    ra = 1.0 - jax.nn.sigmoid(dec_ref[...].astype(jnp.float32))
    s = aa_ref[...].astype(jnp.float32) + cfp_ref[...].astype(jnp.float32)
    o_ref[...] = (ra * s).astype(o_ref.dtype)


def reverse_attention(decoder, aa, cfp):
    B, H, W, C = aa.shape
    M = B * H * W
    tr = M if M <= _ROW_TILE else _ROW_TILE
    out = pl.pallas_call(
        _rev_attn_kernel,
        out_shape=jax.ShapeDtypeStruct((M, C), jnp.bfloat16),
        grid=(pl.cdiv(M, tr),),
        in_specs=[pl.BlockSpec((tr, 1), lambda i: (i, 0)),
                  pl.BlockSpec((tr, C), lambda i: (i, 0)),
                  pl.BlockSpec((tr, C), lambda i: (i, 0))],
        out_specs=pl.BlockSpec((tr, C), lambda i: (i, 0)),
        compiler_params=pltpu.CompilerParams(
            dimension_semantics=("parallel",)),
    )(decoder.reshape(M, 1), aa.reshape(M, C), cfp.reshape(M, C))
    return out.reshape(B, H, W, C)


# ----------------------------------------------------------------------------
# Axial self-attention (AA_kernel): softmax(Q^T K), lane-dense A @ V^T + gamma
# residual.  Batched over a "parallel" grid axis; Q is contracted over its
# leading dim in-kernel (no materialised transpose).
# ----------------------------------------------------------------------------
def _axial_attn_kernel(q_ref, k_ref, v_ref, x_ref, g_ref, o_ref):
    s = jax.lax.dot_general(                       # (axis, axis) = Q^T K
        q_ref[...], k_ref[...], (((0,), (0,)), ((), ())),
        preferred_element_type=jnp.float32)
    s = s - jnp.max(s, axis=-1, keepdims=True)
    e = jnp.exp(s)
    a = e * pl.reciprocal(jnp.sum(e, axis=-1, keepdims=True), approx=True)
    out = jax.lax.dot_general(                     # (axis, Dv) = A V^T
        a.astype(jnp.bfloat16), v_ref[...], (((1,), (1,)), ((), ())),
        preferred_element_type=jnp.float32)
    o_ref[...] = (g_ref[...] * out
                  + x_ref[...].astype(jnp.float32)).astype(o_ref.dtype)


def self_attn(p, x, mode):
    B, H, W, C = x.shape
    q = conv1x1(x, p["q"])
    k = conv1x1(x, p["k"])
    v = conv1x1(x, p["v"])
    axis = H if mode == "h" else "w" == mode and W or W
    axis = H if mode == "h" else W

    # Replicates the PyTorch contiguous-NCHW .view(B, -1, axis) exactly.
    def flat_nchw(t):
        return jnp.transpose(t, (0, 3, 1, 2)).reshape(B, -1, axis)

    qv, kv, vv = flat_nchw(q), flat_nchw(k), flat_nchw(v)
    xt = jnp.transpose(flat_nchw(x), (0, 2, 1))          # (B, axis, Dv)
    D, Dv = qv.shape[1], vv.shape[1]
    out = pl.pallas_call(
        _axial_attn_kernel,
        out_shape=jax.ShapeDtypeStruct((B, axis, Dv), jnp.bfloat16),
        grid=(B,),
        in_specs=[pl.BlockSpec((None, D, axis), lambda b: (b, 0, 0)),
                  pl.BlockSpec((None, D, axis), lambda b: (b, 0, 0)),
                  pl.BlockSpec((None, Dv, axis), lambda b: (b, 0, 0)),
                  pl.BlockSpec((None, axis, Dv), lambda b: (b, 0, 0)),
                  pl.BlockSpec((1, 1), lambda b: (0, 0))],
        out_specs=pl.BlockSpec((None, axis, Dv), lambda b: (b, 0, 0)),
        compiler_params=pltpu.CompilerParams(
            dimension_semantics=("parallel",),
            vmem_limit_bytes=_VMEM_LIMIT),
    )(qv, kv, vv, xt, p["gamma"])
    out = jnp.transpose(out, (0, 2, 1)).reshape(B, C, H, W)
    return jnp.transpose(out, (0, 2, 3, 1))


def aa_kernel(p, x):
    x = conv1x1(x, p["conv0"])                   # 1x1, linear
    x = conv_s1(x, p["conv1"])                   # 3x3, linear
    x = self_attn(p["hattn"], x, "h")
    x = self_attn(p["wattn"], x, "w")
    return x


# ----------------------------------------------------------------------------
# CFP module (simplified dilated pyramid); bn2 is fused into the projection.
# ----------------------------------------------------------------------------
def cfp_module(p, x):
    # TODO(synk): exact grouped multi-stage CFPModule not in reference snippet;
    #             simplified 4-branch dilated pyramid with residual.
    inp = x
    xb = bn_prelu(x, p["bn1"])
    r = conv_s1(xb, p["reduce"])
    branches = [conv_s1(r, bp, dilation=d)
                for bp, d in zip(p["branches"], p["dilations"])]
    y = jnp.concatenate(branches, axis=-1)
    y = conv1x1(y, p["proj"], pre=p["bn2"])      # BN+PReLU fused into 1x1 proj
    return y + inp


# ----------------------------------------------------------------------------
# Bilinear resize, PyTorch align_corners=False semantics (JAX glue)
# ----------------------------------------------------------------------------
def bilinear_resize(x, out_h, out_w):
    B, H, W, C = x.shape
    if (out_h, out_w) == (H, W):
        return x
    ys = (jnp.arange(out_h, dtype=jnp.float32) + 0.5) * (H / out_h) - 0.5
    xs = (jnp.arange(out_w, dtype=jnp.float32) + 0.5) * (W / out_w) - 0.5
    ys = jnp.clip(ys, 0.0, H - 1.0)
    xs = jnp.clip(xs, 0.0, W - 1.0)
    y0 = jnp.floor(ys).astype(jnp.int32)
    x0 = jnp.floor(xs).astype(jnp.int32)
    y1 = jnp.minimum(y0 + 1, H - 1)
    x1 = jnp.minimum(x0 + 1, W - 1)
    wy = (ys - y0.astype(jnp.float32))[None, :, None, None]
    wx = (xs - x0.astype(jnp.float32))[None, None, :, None]

    def g(yi, xi):
        return x[:, yi][:, :, xi]

    top = g(y0, x0) * (1 - wx) + g(y0, x1) * wx
    bot = g(y1, x0) * (1 - wx) + g(y1, x1) * wx
    return top * (1 - wy) + bot * wy


# ----------------------------------------------------------------------------
# Backbone / decode head stand-ins (channel signature 64/128/320/512)
# ----------------------------------------------------------------------------
def backbone(p, x):
    # TODO(synk): MiT transformer backbone not in snippet; conv-pyramid stand-in.
    y = conv_strided(x, p["stem"])
    x1 = conv_strided(y, p["s1"])     # H/4,  64
    x2 = conv_strided(x1, p["s2"])    # H/8,  128
    x3 = conv_strided(x2, p["s3"])    # H/16, 320
    x4 = conv_strided(x3, p["s4"])    # H/32, 512
    return x1, x2, x3, x4


def decode_head(p, feats):
    # TODO(synk): decode_head config not in snippet; MLP-fuse stand-in, 1 class.
    B, H4, W4, _ = feats[0].shape
    acc = None
    for f, pc in zip(feats, p["proj"]):
        y = bilinear_resize(conv1x1(f, pc), H4, W4)
        acc = y if acc is None else acc + y
    y = conv1x1(acc, p["fuse"])
    return conv1x1(y, p["cls"], out_dtype=jnp.float32)


# ----------------------------------------------------------------------------
# ColonFormer forward
# ----------------------------------------------------------------------------
def colonformer_forward(params, x_nchw):
    x = jnp.transpose(x_nchw, (0, 2, 3, 1)).astype(jnp.float32)
    x1, x2, x3, x4 = backbone(params["backbone"], x)
    decoder_1 = decode_head(params["decode_head"], [x1, x2, x3, x4])
    _, H4, W4, _ = decoder_1.shape
    lateral_map_1 = bilinear_resize(decoder_1, 4 * H4, 4 * W4)

    def refine(dec_in, feat, cfp_p, aa_p, ra_p):
        cfp_out = cfp_module(cfp_p, feat)
        h, w = cfp_out.shape[1], cfp_out.shape[2]
        dec = bilinear_resize(dec_in, h, w)
        aa = aa_kernel(aa_p, cfp_out)
        aa_o = reverse_attention(dec, aa, cfp_out)
        ra = conv_s1(aa_o, ra_p[0])
        ra = conv_s1(ra, ra_p[1])
        ra = conv_s1(ra, ra_p[2])
        return ra.astype(jnp.float32) + dec

    x_3 = refine(decoder_1, x4, params["cfp3"], params["aa3"], params["ra3"])
    lateral_map_2 = bilinear_resize(x_3, 32 * x_3.shape[1], 32 * x_3.shape[2])
    x_2 = refine(x_3, x3, params["cfp2"], params["aa2"], params["ra2"])
    lateral_map_3 = bilinear_resize(x_2, 16 * x_2.shape[1], 16 * x_2.shape[2])
    x_1 = refine(x_2, x2, params["cfp1"], params["aa1"], params["ra1"])
    lateral_map_5 = bilinear_resize(x_1, 8 * x_1.shape[1], 8 * x_1.shape[2])

    def to_nchw(t):
        return jnp.transpose(t, (0, 3, 1, 2)).astype(jnp.float32)

    return tuple(map(to_nchw,
                     (lateral_map_5, lateral_map_3, lateral_map_2,
                      lateral_map_1)))


# ----------------------------------------------------------------------------
# Deterministic parameter init (synthetic, shapes match the module __init__).
# Weights are pre-flattened + pre-cast to bf16 and BN params pre-shaped (1, N).
# ----------------------------------------------------------------------------
def init_params(key):
    keys = iter(jax.random.split(key, 512))
    nk = lambda: next(keys)

    def init_conv(k, cin, cout, bn_act):
        w = jax.random.normal(nk(), (k, k, cin, cout), jnp.float32)
        w = w * (1.0 / math.sqrt(k * k * cin))
        wm = w.reshape(k * k * cin, cout).astype(jnp.bfloat16)
        if bn_act:
            scale = 1.0 + 0.1 * jax.random.normal(nk(), (1, cout), jnp.float32)
            bias = 0.1 * jax.random.normal(nk(), (1, cout), jnp.float32)
            alpha = jnp.full((1, cout), 0.25, jnp.float32)
            act = "prelu"
        else:
            scale = jnp.ones((1, cout), jnp.float32)
            bias = jnp.zeros((1, cout), jnp.float32)
            alpha = jnp.zeros((1, cout), jnp.float32)
            act = "linear"
        return {"wm": wm, "scale": scale, "bias": bias, "alpha": alpha,
                "act": act}

    def init_bn(c):
        return {"scale": 1.0 + 0.1 * jax.random.normal(nk(), (1, c), jnp.float32),
                "bias": 0.1 * jax.random.normal(nk(), (1, c), jnp.float32),
                "alpha": jnp.full((1, c), 0.25, jnp.float32)}

    def init_cfp(c, d=8):
        cr = c // 4
        dil = [1, d // 4 + 1, d // 2 + 1, d + 1]
        return {"bn1": init_bn(c),
                "reduce": init_conv(3, c, cr, True),
                "branches": [init_conv(3, cr, cr, True) for _ in dil],
                "dilations": dil,
                "bn2": init_bn(c),
                "proj": init_conv(1, c, c, False)}

    def init_attn(c):
        return {"q": init_conv(1, c, c // 8, False),
                "k": init_conv(1, c, c // 8, False),
                "v": init_conv(1, c, c, False),
                # nn.Parameter(torch.zeros(1)) in the module; nonzero here so
                # the attention path contributes (synthetic init).
                "gamma": jnp.full((1, 1), 0.1, jnp.float32)}

    def init_aa(c):
        return {"conv0": init_conv(1, c, c, False),
                "conv1": init_conv(3, c, c, False),
                "hattn": init_attn(c),
                "wattn": init_attn(c)}

    def init_ra(c):
        return [init_conv(3, c, 32, True),
                init_conv(3, 32, 32, True),
                init_conv(3, 32, 1, True)]

    p = {}
    p["backbone"] = {"stem": init_conv(3, 3, 32, True),
                     "s1": init_conv(3, 32, 64, True),
                     "s2": init_conv(3, 64, 128, True),
                     "s3": init_conv(3, 128, 320, True),
                     "s4": init_conv(3, 320, 512, True)}
    p["decode_head"] = {"proj": [init_conv(1, c, 64, False)
                                 for c in (64, 128, 320, 512)],
                        "fuse": init_conv(1, 64, 64, True),
                        "cls": init_conv(1, 64, 1, False)}
    p["cfp1"], p["cfp2"], p["cfp3"] = init_cfp(128), init_cfp(320), init_cfp(512)
    p["aa1"], p["aa2"], p["aa3"] = init_aa(128), init_aa(320), init_aa(512)
    p["ra1"], p["ra2"], p["ra3"] = init_ra(128), init_ra(320), init_ra(512)
    return p


if __name__ == "__main__":
    key = jax.random.PRNGKey(0)
    pkey, xkey = jax.random.split(key)
    params = init_params(pkey)

    # NCHW input, like the PyTorch module (spatial must be >= 32 for x4 >= 1).
    x = jax.random.normal(xkey, (2, 3, 64, 64), jnp.float32)

    outs = colonformer_forward(params, x)
    outs = jax.block_until_ready(outs)

    expected = (2, 1, 64, 64)
    assert all(o.shape == expected for o in outs), [o.shape for o in outs]
    assert all(bool(jnp.all(jnp.isfinite(o))) for o in outs)
    print("KERNEL_OK")
</pallas_src>

<mosaic_0001>
module attributes {stable_mosaic.version = 11 : i64} {
  func.func @kernel(%arg0: i32, %arg1: memref<512x27xbf16, #tpu.memory_space<vmem>>, %arg2: memref<27x32xbf16, #tpu.memory_space<vmem>>, %arg3: memref<1x32xf32, #tpu.memory_space<vmem>>, %arg4: memref<1x32xf32, #tpu.memory_space<vmem>>, %arg5: memref<1x32xf32, #tpu.memory_space<vmem>>, %arg6: memref<512x32xbf16, #tpu.memory_space<vmem>>) attributes {dimension_semantics = [#tpu.dimension_semantics<parallel>], iteration_bounds = array<i64: 4>, scalar_prefetch = 0 : i64, scratch_operands = 0 : i64, tpu.core_type = #tpu.core_type<tc>, window_params = [{transform_indices = @transform_0, window_bounds = array<i64: 512, 27>}, {pipeline_mode = #tpu.pipeline_mode<synchronous>, transform_indices = @transform_1, window_bounds = array<i64: 27, 32>}, {pipeline_mode = #tpu.pipeline_mode<synchronous>, transform_indices = @transform_2, window_bounds = array<i64: 1, 32>}, {pipeline_mode = #tpu.pipeline_mode<synchronous>, transform_indices = @transform_3, window_bounds = array<i64: 1, 32>}, {pipeline_mode = #tpu.pipeline_mode<synchronous>, transform_indices = @transform_4, window_bounds = array<i64: 1, 32>}, {transform_indices = @transform_5, window_bounds = array<i64: 512, 32>}]} {
    %c0 = arith.constant 0 : index
    %c0_0 = arith.constant 0 : index
    %0 = vector.load %arg1[%c0, %c0_0] : memref<512x27xbf16, #tpu.memory_space<vmem>>, vector<512x27xbf16>
    %c0_1 = arith.constant 0 : index
    %c0_2 = arith.constant 0 : index
    %1 = vector.load %arg2[%c0_1, %c0_2] : memref<27x32xbf16, #tpu.memory_space<vmem>>, vector<27x32xbf16>
    %cst = arith.constant dense<0.000000e+00> : vector<512x32xf32>
    %2 = tpu.matmul %0, %1, %cst {dimension_numbers = #tpu.dot_dimension_numbers<[1], [0], [0], [1], [0, 0, 1, 1], [], []>} : vector<512x27xbf16>, vector<27x32xbf16>, vector<512x32xf32> -> vector<512x32xf32>
    %c0_3 = arith.constant 0 : index
    %c0_4 = arith.constant 0 : index
    %3 = vector.load %arg3[%c0_3, %c0_4] : memref<1x32xf32, #tpu.memory_space<vmem>>, vector<1x32xf32>
    %4 = vector.broadcast %3 : vector<1x32xf32> to vector<512x32xf32>
    %5 = arith.mulf %2, %4 : vector<512x32xf32>
    %c0_5 = arith.constant 0 : index
    %c0_6 = arith.constant 0 : index
    %6 = vector.load %arg4[%c0_5, %c0_6] : memref<1x32xf32, #tpu.memory_space<vmem>>, vector<1x32xf32>
    %7 = vector.broadcast %6 : vector<1x32xf32> to vector<512x32xf32>
    %8 = arith.addf %5, %7 : vector<512x32xf32>
    %cst_7 = arith.constant 0.000000e+00 : f32
    %9 = vector.broadcast %cst_7 : f32 to vector<512x32xf32>
    %10 = arith.cmpf ogt, %8, %9 : vector<512x32xf32>
    %c0_8 = arith.constant 0 : index
    %c0_9 = arith.constant 0 : index
    %11 = vector.load %arg5[%c0_8, %c0_9] : memref<1x32xf32, #tpu.memory_space<vmem>>, vector<1x32xf32>
    %12 = vector.broadcast %11 : vector<1x32xf32> to vector<512x32xf32>
    %13 = arith.mulf %12, %8 : vector<512x32xf32>
    %14 = arith.select %10, %8, %13 : vector<512x32xi1>, vector<512x32xf32>
    %15 = arith.truncf %14 : vector<512x32xf32> to vector<512x32xbf16>
    %c0_10 = arith.constant 0 : index
    %c0_11 = arith.constant 0 : index
    %16 = vector.load %arg6[%c0_10, %c0_11] : memref<512x32xbf16, #tpu.memory_space<vmem>>, vector<512x32xbf16>
    tpu.vector_store %arg6[%c0_10, %c0_11], %15 {strides = array<i32>} : memref<512x32xbf16, #tpu.memory_space<vmem>>, vector<512x32xbf16>,
    return
  }
  func.func @transform_0(%arg0: i32) -> (i32, i32) {
    %c0_i32 = arith.constant 0 : i32
    %c0_i32_0 = arith.constant 0 : i32
    return %arg0, %c0_i32 : i32, i32
  }
  func.func @transform_1(%arg0: i32) -> (i32, i32) {
    %c0_i32 = arith.constant 0 : i32
    %c0_i32_0 = arith.constant 0 : i32
    %c0_i32_1 = arith.constant 0 : i32
    return %c0_i32, %c0_i32_0 : i32, i32
  }
  func.func @transform_2(%arg0: i32) -> (i32, i32) {
    %c0_i32 = arith.constant 0 : i32
    %c0_i32_0 = arith.constant 0 : i32
    %c0_i32_1 = arith.constant 0 : i32
    return %c0_i32, %c0_i32_0 : i32, i32
  }
  func.func @transform_3(%arg0: i32) -> (i32, i32) {
    %c0_i32 = arith.constant 0 : i32
    %c0_i32_0 = arith.constant 0 : i32
    %c0_i32_1 = arith.constant 0 : i32
    return %c0_i32, %c0_i32_0 : i32, i32
  }
  func.func @transform_4(%arg0: i32) -> (i32, i32) {
    %c0_i32 = arith.constant 0 : i32
    %c0_i32_0 = arith.constant 0 : i32
    %c0_i32_1 = arith.constant 0 : i32
    return %c0_i32, %c0_i32_0 : i32, i32
  }
  func.func @transform_5(%arg0: i32) -> (i32, i32) {
    %c0_i32 = arith.constant 0 : i32
    %c0_i32_0 = arith.constant 0 : i32
    return %arg0, %c0_i32 : i32, i32
  }
}

</mosaic_0001>

<bundles_post_ra>
// kernel: tpu_custom_call.1
= control target key start
LH: loop header
LB: loop body
LE: loop exit
PB: predicated region body
PF: predicated region fallthrough
CT: control target
= control target key end

     0   :  { %s1975_s18 = smov 0   ;;  %s2533_s0 = inlined_call_operand.vmem [shape: bf16[2048,27], index: 0, kind: input, shape index: {}]   ;;  %s2534_s1 = inlined_call_operand.vmem [shape: bf16[27,32], index: 1, kind: input, shape index: {}]   ;;  %s2535_s2 = inlined_call_operand.vmem [shape: f32[1,32], index: 2, kind: input, shape index: {}]   ;;  %s2536_s3 = inlined_call_operand.vmem [shape: f32[1,32], index: 3, kind: input, shape index: {}]   ;;  %s2537_s4 = inlined_call_operand.vmem [shape: f32[1,32], index: 4, kind: input, shape index: {}]   ;;  %s2538_s5 = inlined_call_operand.vmem [shape: bf16[2048,32], index: 5, kind: output, shape index: {}]  }
   0x1 LB: > { %s1579_s19 = sadd.s32 4294967295, %s1942_s18   ;;  %p1583_p0 = scmp.ge.s32.totalorder %s1942_s18, 1  ;;  %s1942_s18 = sphi %s1975_s18, %s15_s18  }
   0x2   : > { %p188_p1 = scmp.lt.s32.totalorder %s1942_s18, 5 }
   0x4   : > { %p189_p2 = pnand %p1583_p0, %p188_p1 }
   0x5   : > { %v1902_v0 = vld [vmem:[%s2534_s1] sm:$0xff] (!%p189_p2)   ;;  %vm565_vm0 = vcmask (!%p189_p2), 1044480   ;;  %v1903_v1 = vld [vmem:[%s2534_s1 + $0x8] sm:$0x3f] (!%p189_p2)   ;;  %vm566_vm1 = vcmask (!%p189_p2), 1045504   ;;  %s1584_s24 = sshll.u32 (!%p189_p2), %s1579_s19, 6 }
   0x6   : > { %192 = sbr.rel (%p189_p2) target bundleno = 336 (0x150), region = 40  ;;  %1821 = vmatprep.subr.bf16.mxu0 (!%p189_p2), %v1902_v0  ;;  %1889 = vmatprep.subr.bf16.mxu1 (!%p189_p2), %v1902_v0  ;;  %v1944_v2 = vmov (!%p189_p2), 65535   ;;  %p217_p3 = scmp.lt.s32.totalorder (!%p189_p2), %s1584_s24, 255  ;;  %vm468_vm2 = vcmask (!%p189_p2), 220160   ;;  %v2066_v38 = vld [vmem:[%s2535_s2] ss:$0 sm:$0xff] (!%p189_p2) }
   0x7   : > { %1822 = vmatpush3.bf16.msra.mxu0 (!%p189_p2), %v1902_v0  ;;  %1891 = vmatpush3.bf16.msra.mxu1 (!%p189_p2), %v1902_v0  ;;  %v567_v3 = vsel (!%p189_p2), %vm565_vm0, 4294967295, %v1944_v2  ;;  %v2071_v40 = vld [vmem:[%s2536_s3] ss:$0 sm:$0xff] (!%p189_p2)  ;;  %vm1458_vm3 = vcmask (!%p189_p2), 257024  }
   0x8   : > { %v568_v4 = vsel (!%p189_p2), %vm566_vm1, %v567_v3, 0  ;;  %v2077_v44 = vld [vmem:[%s2537_s4] ss:$0 sm:$0xff] (!%p189_p2) }
   0x9   : > { %v570_v5 = vand.u32 (!%p189_p2), %v1903_v1, %v568_v4 }
   0xb   : > { %1823 = vmatprep.subr.bf16.mxu0 (!%p189_p2), %v570_v5  ;;  %1890 = vmatprep.subr.bf16.mxu1 (!%p189_p2), %v570_v5 }
   0xc   : > { %1824 = vmatpush3.bf16.msra.mxu0 (!%p189_p2), %v570_v5  ;;  %1892 = vmatpush3.bf16.msra.mxu1 (!%p189_p2), %v570_v5 }
   0xd   : > { %s2540_s24 = smov (!%p217_p3, %s1584_s24), 255 }
   0xe   : > { %s1585_s25 = sshll.u32 %s2540_s24, 2 }
   0xf   : > { %s1997_s28 = scalar_lea.vmem %s2533_s0, %s1585_s25  ;;  %s2098_s12 = scalar_lea.vmem %s2538_s5, %s1585_s25 }
  0x10   : > { %v1904_v6 = vld [vmem:[%s1997_s28] sm:$0xff]   ;;  %v1906_v8 = vld [vmem:[%s1997_s28 + $0x8] sm:$0xff]   ;;  %v1908_v10 = vld [vmem:[%s1997_s28 + $0x10] sm:$0xff]  }
  0x11   : > { %v1905_v7 = vld [vmem:[%s1997_s28 + $0x80] sm:$0xff]   ;;  %1825 = vmatprep.mubr.msk.bf16.mxu0 %vm468_vm2, %v1904_v6  ;;  %v1907_v9 = vld [vmem:[%s1997_s28 + $0x88] sm:$0xff]   ;;  %v1909_v11 = vld [vmem:[%s1997_s28 + $0x90] sm:$0xff]  }
  0x12   : > { %1857 = vmatprep.mubr.msk.bf16.mxu1 %vm468_vm2, %v1905_v7  ;;  %1826 = vmatmul.mubr.msk.bf16.vlgmr.msra.gmra.mrb[0].mxu0 %vm468_vm2, %v1906_v8  ;;  %v1910_v12 = vld [vmem:[%s1997_s28 + $0x18] sm:$0xff]   ;;  %v1912_v14 = vld [vmem:[%s1997_s28 + $0x20] sm:$0xff]   ;;  %v1914_v16 = vld [vmem:[%s1997_s28 + $0x28] sm:$0xff]  }
  0x13   : > { %1858 = vmatmul.mubr.msk.bf16.vlgmr.msra.gmra.mrb[0].mxu1 %vm468_vm2, %v1907_v9  ;;  %1829 = vmatprep.mubr.msk.bf16.mxu0 %vm468_vm2, %v1908_v10  ;;  %v1911_v13 = vld [vmem:[%s1997_s28 + $0x98] sm:$0xff]   ;;  %v1913_v15 = vld [vmem:[%s1997_s28 + $0xa0] sm:$0xff]   ;;  %v1915_v17 = vld [vmem:[%s1997_s28 + $0xa8] sm:$0xff]  }
  0x14   : > { %1861 = vmatprep.mubr.msk.bf16.mxu1 %vm468_vm2, %v1909_v11  ;;  %v1916_v18 = vld [vmem:[%s1997_s28 + $0x30] sm:$0xff]   ;;  %v1918_v20 = vld [vmem:[%s1997_s28 + $0x38] sm:$0xff]   ;;  %v1920_v22 = vld [vmem:[%s1997_s28 + $0x40] sm:$0xff]  }
  0x15   : > { %v1917_v19 = vld [vmem:[%s1997_s28 + $0xb0] sm:$0xff]   ;;  %v1919_v21 = vld [vmem:[%s1997_s28 + $0xb8] sm:$0xff]   ;;  %v1921_v23 = vld [vmem:[%s1997_s28 + $0xc0] sm:$0xff]  }
  0x16   : > { %v1922_v24 = vld [vmem:[%s1997_s28 + $0x48] sm:$0xff]   ;;  %v1924_v26 = vld [vmem:[%s1997_s28 + $0x50] sm:$0xff]   ;;  %v1926_v28 = vld [vmem:[%s1997_s28 + $0x58] sm:$0xff]  }
  0x17   : > { %v1923_v25 = vld [vmem:[%s1997_s28 + $0xc8] sm:$0xff]   ;;  %v1925_v27 = vld [vmem:[%s1997_s28 + $0xd0] sm:$0xff]   ;;  %v1927_v29 = vld [vmem:[%s1997_s28 + $0xd8] sm:$0xff]  }
  0x18   : > { %v1928_v30 = vld [vmem:[%s1997_s28 + $0x60] sm:$0xff]   ;;  %v1930_v32 = vld [vmem:[%s1997_s28 + $0x68] sm:$0xff]   ;;  %v1932_v34 = vld [vmem:[%s1997_s28 + $0x70] sm:$0xff]  }
  0x19   : > { %v1929_v31 = vld [vmem:[%s1997_s28 + $0xe0] sm:$0xff]   ;;  %v1931_v33 = vld [vmem:[%s1997_s28 + $0xe8] sm:$0xff]   ;;  %v1933_v35 = vld [vmem:[%s1997_s28 + $0xf0] sm:$0xff]  }
  0x1a   : > { %1830 = vmatmul.mubr.msk.bf16.gmra.mrb[4].mxu0 %vm468_vm2, %v1910_v12  ;;  %v1934_v36 = vld [vmem:[%s1997_s28 + $0x78] sm:$0xff]  }
  0x1b   : > { %1862 = vmatmul.mubr.msk.bf16.gmra.mrb[4].mxu1 %vm468_vm2, %v1911_v13  ;;  %1833 = vmatprep.mubr.msk.bf16.mxu0 %vm468_vm2, %v1912_v14  ;;  %v1935_v37 = vld [vmem:[%s1997_s28 + $0xf8] sm:$0xff]  }
  0x1c   : > { %1865 = vmatprep.mubr.msk.bf16.mxu1 %vm468_vm2, %v1913_v15 }
  0x22   : > { %1834 = vmatmul.mubr.msk.bf16.gmra.mrb[8].mxu0 %vm468_vm2, %v1914_v16 }
  0x23   : > { %1866 = vmatmul.mubr.msk.bf16.gmra.mrb[8].mxu1 %vm468_vm2, %v1915_v17  ;;  %1837 = vmatprep.mubr.msk.bf16.mxu0 %vm468_vm2, %v1916_v18 }
  0x24   : > { %1869 = vmatprep.mubr.msk.bf16.mxu1 %vm468_vm2, %v1917_v19 }
  0x2a   : > { %1838 = vmatmul.mubr.msk.bf16.gmra.mrb[12].mxu0 %vm468_vm2, %v1918_v20 }
  0x2b   : > { %1870 = vmatmul.mubr.msk.bf16.gmra.mrb[12].mxu1 %vm468_vm2, %v1919_v21  ;;  %1841 = vmatprep.mubr.msk.bf16.mxu0 %vm468_vm2, %v1920_v22 }
  0x2c   : > { %1873 = vmatprep.mubr.msk.bf16.mxu1 %vm468_vm2, %v1921_v23 }
  0x32   : > { %1842 = vmatmul.mubr.msk.bf16.gmra.mrb[16].mxu0 %vm468_vm2, %v1922_v24 }
  0x33   : > { %1874 = vmatmul.mubr.msk.bf16.gmra.mrb[16].mxu1 %vm468_vm2, %v1923_v25  ;;  %1845 = vmatprep.mubr.msk.bf16.mxu0 %vm468_vm2, %v1924_v26 }
  0x34   : > { %1877 = vmatprep.mubr.msk.bf16.mxu1 %vm468_vm2, %v1925_v27 }
  0x3a   : > { %1846 = vmatmul.mubr.msk.bf16.gmra.mrb[20].mxu0 %vm468_vm2, %v1926_v28 }
  0x3b   : > { %1878 = vmatmul.mubr.msk.bf16.gmra.mrb[20].mxu1 %vm468_vm2, %v1927_v29  ;;  %1849 = vmatprep.mubr.msk.bf16.mxu0 %vm468_vm2, %v1928_v30 }
  0x3c   : > { %1881 = vmatprep.mubr.msk.bf16.mxu1 %vm468_vm2, %v1929_v31 }
  0x42   : > { %1850 = vmatmul.mubr.msk.bf16.gmra.mrb[24].mxu0 %vm468_vm2, %v1930_v32 }
  0x43   : > { %1882 = vmatmul.mubr.msk.bf16.gmra.mrb[24].mxu1 %vm468_vm2, %v1931_v33  ;;  %1853 = vmatprep.mubr.msk.bf16.mxu0 %vm468_vm2, %v1932_v34 }
  0x44   : > { %1885 = vmatprep.mubr.msk.bf16.mxu1 %vm468_vm2, %v1933_v35 }
  0x4a   : > { %1854 = vmatmul.mubr.msk.bf16.gmra.mrb[28].mxu0 %vm468_vm2, %v1934_v36 }
  0x4b   : > { %1886 = vmatmul.mubr.msk.bf16.gmra.mrb[28].mxu1 %vm468_vm2, %v1935_v37 }
  0xe5   : > { %v1827_v39 = vpop.f32.mrb[0].mxu0 }
  0xe6   : > { %v870_v41 = vmul.f32 %v1827_v39, %v2066_v38  ;;  %v1859_v42 = vpop.f32.mrb[0].mxu1  ;;  %v606_v43 = vpop.f32.mrb[1].mxu0 }
  0xe7   : > { %v902_v45 = vmul.f32 %v1859_v42, %v2066_v38  ;;  %v868_v46 = vmul.f32 %v2066_v38, %v606_v43  ;;  %v734_v47 = vpop.f32.mrb[1].mxu1  ;;  %v1828_v48 = vpop.f32.mrb[2].mxu0 }
  0xe8   : > { %v941_v49 = vadd.f32 %v2071_v40, %v870_v41  ;;  %v900_v50 = vmul.f32 %v2066_v38, %v734_v47  ;;  %v871_v51 = vmul.f32 %v1828_v48, %v2066_v38  ;;  %v1860_v52 = vpop.f32.mrb[2].mxu1  ;;  %v609_v53 = vpop.f32.mrb[3].mxu0 }
  0xe9   : > { %v973_v54 = vadd.f32 %v2071_v40, %v902_v45  ;;  %v939_v55 = vadd.f32 %v2071_v40, %v868_v46  ;;  %v903_v56 = vmul.f32 %v1860_v52, %v2066_v38  ;;  %v869_v57 = vmul.f32 %v2066_v38, %v609_v53  ;;  %v737_v58 = vpop.f32.mrb[3].mxu1 }
  0xea   : > { %vm1005_vm4 = vcmp.gt.f32.partialorder %v941_v49, 0.0  ;;  %v1076_v59 = vmul.f32 %v2077_v44, %v941_v49  ;;  %v971_v60 = vadd.f32 %v2071_v40, %v900_v50  ;;  %v942_v61 = vadd.f32 %v2071_v40, %v871_v51 }
  0xeb   : > { %vm1037_vm5 = vcmp.gt.f32.partialorder %v973_v54, 0.0  ;;  %v1108_v62 = vmul.f32 %v2077_v44, %v973_v54  ;;  %vm1003_vm6 = vcmp.gt.f32.partialorder %v939_v55, 0.0  ;;  %v1074_v63 = vmul.f32 %v2077_v44, %v939_v55 }
  0xec   : > { %v1140_v0 = vsel %vm1005_vm4, %v941_v49, %v1076_v59  ;;  %vm1035_vm7 = vcmp.gt.f32.partialorder %v971_v60, 0.0  ;;  %v1106_v1 = vmul.f32 %v2077_v44, %v971_v60  ;;  %vm1006_vm8 = vcmp.gt.f32.partialorder %v942_v61, 0.0 }
  0xed   : > { %v1725_v2 = vpack.c.bf16 %v1140_v0, %v1140_v0  ;;  %v1172_v3 = vsel %vm1037_vm5, %v973_v54, %v1108_v62  ;;  %v1138_v4 = vsel %vm1003_vm6, %v939_v55, %v1074_v63  ;;  %v1077_v5 = vmul.f32 %v2077_v44, %v942_v61  ;;  %v1831_v6 = vpop.f32.mrb[4].mxu0 }
  0xee   : > { %v1757_v7 = vpack.c.bf16 %v1172_v3, %v1172_v3  ;;  %v1723_v8 = vpack.c.bf16 %v1138_v4, %v1138_v4  ;;  %v1170_v9 = vsel %vm1035_vm7, %v971_v60, %v1106_v1  ;;  %v974_v10 = vadd.f32 %v2071_v40, %v903_v56  ;;  %v1863_v11 = vpop.f32.mrb[4].mxu1  ;;  %v622_v12 = vpop.f32.mrb[5].mxu0 }
  0xef   : > { %1461 = vst.msk [vmem:[%s2098_s12 + $0x8] sm:$0xf] %vm1458_vm3, %v1725_v2  ;;  %v1755_v13 = vpack.c.bf16 %v1170_v9, %v1170_v9  ;;  %v1141_v14 = vsel %vm1006_vm8, %v942_v61, %v1077_v5  ;;  %v940_v15 = vadd.f32 %v2071_v40, %v869_v57  ;;  %v901_v16 = vmul.f32 %v2066_v38, %v737_v58  ;;  %v750_v17 = vpop.f32.mrb[5].mxu1  ;;  %v1832_v18 = vpop.f32.mrb[6].mxu0 }
  0xf0   : > { %1493 = vst.msk [vmem:[%s2098_s12 + $0x88] sm:$0xf] %vm1458_vm3, %v1757_v7  ;;  %1459 = vst.msk [vmem:[%s2098_s12] sm:$0xf] %vm1458_vm3, %v1723_v8  ;;  %v1726_v19 = vpack.c.bf16 %v1141_v14, %v1141_v14  ;;  %vm1038_vm9 = vcmp.gt.f32.partialorder %v974_v10, 0.0  ;;  %v1109_v20 = vmul.f32 %v2077_v44, %v974_v10  ;;  %v874_v21 = vmul.f32 %v1831_v6, %v2066_v38  ;;  %v1864_v22 = vpop.f32.mrb[6].mxu1 }
  0xf1   : > { %v625_v23 = vpop.f32.mrb[7].mxu0  ;;  %1491 = vst.msk [vmem:[%s2098_s12 + $0x80] sm:$0xf] %vm1458_vm3, %v1755_v13  ;;  %vm1004_vm10 = vcmp.gt.f32.partialorder %v940_v15, 0.0  ;;  %v1075_v24 = vmul.f32 %v2077_v44, %v940_v15  ;;  %v972_v25 = vadd.f32 %v2071_v40, %v901_v16  ;;  %v906_v26 = vmul.f32 %v1863_v11, %v2066_v38  ;;  %v753_v27 = vpop.f32.mrb[7].mxu1 }
  0xf2   : > { %1462 = vst.msk [vmem:[%s2098_s12 + $0xc] sm:$0xf] %vm1458_vm3, %v1726_v19  ;;  %v1173_v28 = vsel %vm1038_vm9, %v974_v10, %v1109_v20  ;;  %v945_v29 = vadd.f32 %v2071_v40, %v874_v21  ;;  %v872_v30 = vmul.f32 %v2066_v38, %v622_v12  ;;  %v904_v31 = vmul.f32 %v2066_v38, %v750_v17 }
  0xf3   : > { %v1758_v32 = vpack.c.bf16 %v1173_v28, %v1173_v28  ;;  %v1139_v33 = vsel %vm1004_vm10, %v940_v15, %v1075_v24  ;;  %vm1036_vm11 = vcmp.gt.f32.partialorder %v972_v25, 0.0  ;;  %v1107_v34 = vmul.f32 %v2077_v44, %v972_v25 }
  0xf4   : > { %v1724_v35 = vpack.c.bf16 %v1139_v33, %v1139_v33  ;;  %vm1009_vm12 = vcmp.gt.f32.partialorder %v945_v29, 0.0  ;;  %v1080_v36 = vmul.f32 %v2077_v44, %v945_v29  ;;  %v977_v37 = vadd.f32 %v2071_v40, %v906_v26 }
  0xf5   : > { %1494 = vst.msk [vmem:[%s2098_s12 + $0x8c] sm:$0xf] %vm1458_vm3, %v1758_v32  ;;  %v1171_v39 = vsel %vm1036_vm11, %v972_v25, %v1107_v34  ;;  %v943_v41 = vadd.f32 %v2071_v40, %v872_v30  ;;  %v975_v42 = vadd.f32 %v2071_v40, %v904_v31  ;;  %v875_v43 = vmul.f32 %v1832_v18, %v2066_v38  ;;  %v1835_v45 = vpop.f32.mrb[8].mxu0 }
  0xf6   : > { %1460 = vst.msk [vmem:[%s2098_s12 + $0x4] sm:$0xf] %vm1458_vm3, %v1724_v35  ;;  %v1756_v46 = vpack.c.bf16 %v1171_v39, %v1171_v39  ;;  %v1144_v47 = vsel %vm1009_vm12, %v945_v29, %v1080_v36  ;;  %vm1041_vm13 = vcmp.gt.f32.partialorder %v977_v37, 0.0  ;;  %v1112_v48 = vmul.f32 %v2077_v44, %v977_v37  ;;  %v1867_v49 = vpop.f32.mrb[8].mxu1  ;;  %v638_v50 = vpop.f32.mrb[9].mxu0 }
  0xf7   : > { %v1729_v51 = vpack.c.bf16 %v1144_v47, %v1144_v47  ;;  %vm1007_vm14 = vcmp.gt.f32.partialorder %v943_v41, 0.0  ;;  %v1078_v52 = vmul.f32 %v2077_v44, %v943_v41  ;;  %vm1039_vm15 = vcmp.gt.f32.partialorder %v975_v42, 0.0  ;;  %v766_v53 = vpop.f32.mrb[9].mxu1  ;;  %v2135_v54 = vpop.f32.mrb[10].mxu0 }
  0xf8   : > { %1492 = vst.msk [vmem:[%s2098_s12 + $0x84] sm:$0xf] %vm1458_vm3, %v1756_v46  ;;  %v1176_v55 = vsel %vm1041_vm13, %v977_v37, %v1112_v48  ;;  %v1110_v56 = vmul.f32 %v2077_v44, %v975_v42  ;;  %v946_v57 = vadd.f32 %v2071_v40, %v875_v43  ;;  %v907_v58 = vmul.f32 %v1864_v22, %v2066_v38  ;;  %v1868_v59 = vpop.f32.mrb[10].mxu1  ;;  %v641_v60 = vpop.f32.mrb[11].mxu0 }
  0xf9   : > { %1465 = vst.msk [vmem:[%s2098_s12 + $0x18] sm:$0xf] %vm1458_vm3, %v1729_v51  ;;  %v1761_v61 = vpack.c.bf16 %v1176_v55, %v1176_v55  ;;  %v1142_v62 = vsel %vm1007_vm14, %v943_v41, %v1078_v52  ;;  %v873_v63 = vmul.f32 %v2066_v38, %v625_v23  ;;  %v905_v0 = vmul.f32 %v2066_v38, %v753_v27  ;;  %v2146_v1 = vpop.f32.mrb[11].mxu1 }
  0xfa   : > { %v1727_v2 = vpack.c.bf16 %v1142_v62, %v1142_v62  ;;  %v1174_v3 = vsel %vm1039_vm15, %v975_v42, %v1110_v56  ;;  %vm1010_vm0 = vcmp.gt.f32.partialorder %v946_v57, 0.0  ;;  %v1081_v4 = vmul.f32 %v2077_v44, %v946_v57 }
  0xfb   : > { %1497 = vst.msk [vmem:[%s2098_s12 + $0x98] sm:$0xf] %vm1458_vm3, %v1761_v61  ;;  %v1759_v5 = vpack.c.bf16 %v1174_v3, %v1174_v3  ;;  %v978_v6 = vadd.f32 %v2071_v40, %v907_v58  ;;  %v944_v7 = vadd.f32 %v2071_v40, %v873_v63  ;;  %v976_v8 = vadd.f32 %v2071_v40, %v905_v0 }
  0xfc   : > { %1463 = vst.msk [vmem:[%s2098_s12 + $0x10] sm:$0xf] %vm1458_vm3, %v1727_v2  ;;  %v1145_v9 = vsel %vm1010_vm0, %v946_v57, %v1081_v4  ;;  %v878_v10 = vmul.f32 %v1835_v45, %v2066_v38  ;;  %v910_v11 = vmul.f32 %v1867_v49, %v2066_v38  ;;  %v876_v12 = vmul.f32 %v2066_v38, %v638_v50 }
  0xfd   : > { %1495 = vst.msk [vmem:[%s2098_s12 + $0x90] sm:$0xf] %vm1458_vm3, %v1759_v5  ;;  %v1730_v13 = vpack.c.bf16 %v1145_v9, %v1145_v9  ;;  %vm1042_vm1 = vcmp.gt.f32.partialorder %v978_v6, 0.0  ;;  %v1113_v14 = vmul.f32 %v2077_v44, %v978_v6  ;;  %vm1008_vm2 = vcmp.gt.f32.partialorder %v944_v7, 0.0  ;;  %v1839_v15 = vpop.f32.mrb[12].mxu0 }
  0xfe   : > { %v1079_v16 = vmul.f32 %v2077_v44, %v944_v7  ;;  %vm1040_vm4 = vcmp.gt.f32.partialorder %v976_v8, 0.0  ;;  %v1111_v17 = vmul.f32 %v2077_v44, %v976_v8  ;;  %v949_v18 = vadd.f32 %v2071_v40, %v878_v10  ;;  %v1871_v19 = vpop.f32.mrb[12].mxu1  ;;  %v2166_v20 = vpop.f32.mrb[13].mxu0 }
  0xff   : > { %1466 = vst.msk [vmem:[%s2098_s12 + $0x1c] sm:$0xf] %vm1458_vm3, %v1730_v13  ;;  %v1177_v21 = vsel %vm1042_vm1, %v978_v6, %v1113_v14  ;;  %v981_v22 = vadd.f32 %v2071_v40, %v910_v11  ;;  %v947_v23 = vadd.f32 %v2071_v40, %v876_v12  ;;  %v908_v24 = vmul.f32 %v2066_v38, %v766_v53  ;;  %v2173_v25 = vpop.f32.mrb[13].mxu1  ;;  %v2175_v26 = vpop.f32.mrb[14].mxu0 }
 0x100   : > { %v1762_v27 = vpack.c.bf16 %v1177_v21, %v1177_v21  ;;  %v1143_v28 = vsel %vm1008_vm2, %v944_v7, %v1079_v16  ;;  %v1175_v29 = vsel %vm1040_vm4, %v976_v8, %v1111_v17  ;;  %vm1013_vm5 = vcmp.gt.f32.partialorder %v949_v18, 0.0  ;;  %v2178_v30 = vpop.f32.mrb[14].mxu1  ;;  %v2180_v31 = vpop.f32.mrb[15].mxu0 }
 0x101   : > { %v1728_v32 = vpack.c.bf16 %v1143_v28, %v1143_v28  ;;  %v1760_v33 = vpack.c.bf16 %v1175_v29, %v1175_v29  ;;  %v1084_v34 = vmul.f32 %v2077_v44, %v949_v18  ;;  %vm1045_vm6 = vcmp.gt.f32.partialorder %v981_v22, 0.0  ;;  %v2183_v35 = vpop.f32.mrb[15].mxu1 }
 0x102   : > { %1498 = vst.msk [vmem:[%s2098_s12 + $0x9c] sm:$0xf] %vm1458_vm3, %v1762_v27  ;;  %v1116_v36 = vmul.f32 %v2077_v44, %v981_v22  ;;  %vm1011_vm7 = vcmp.gt.f32.partialorder %v947_v23, 0.0  ;;  %v1082_v37 = vmul.f32 %v2077_v44, %v947_v23  ;;  %v979_v39 = vadd.f32 %v2071_v40, %v908_v24 }
 0x103   : > { %1464 = vst.msk [vmem:[%s2098_s12 + $0x14] sm:$0xf] %vm1458_vm3, %v1728_v32  ;;  %1496 = vst.msk [vmem:[%s2098_s12 + $0x94] sm:$0xf] %vm1458_vm3, %v1760_v33  ;;  %v1148_v41 = vsel %vm1013_vm5, %v949_v18, %v1084_v34  ;;  %v879_v42 = vmul.f32 %v2135_v54, %v2066_v38  ;;  %v911_v43 = vmul.f32 %v1868_v59, %v2066_v38 }
 0x104   : > { %v877_v45 = vmul.f32 %v2066_v38, %v641_v60  ;;  %v1733_v46 = vpack.c.bf16 %v1148_v41, %v1148_v41  ;;  %v1180_v47 = vsel %vm1045_vm6, %v981_v22, %v1116_v36  ;;  %v1146_v48 = vsel %vm1011_vm7, %v947_v23, %v1082_v37 }
 0x105   : > { %vm1043_vm8 = vcmp.gt.f32.partialorder %v979_v39, 0.0  ;;  %v1765_v49 = vpack.c.bf16 %v1180_v47, %v1180_v47  ;;  %v1731_v50 = vpack.c.bf16 %v1146_v48, %v1146_v48  ;;  %v1114_v51 = vmul.f32 %v2077_v44, %v979_v39  ;;  %v2200_v53 = vpop.f32.mrb[16].mxu0 }
 0x106   : > { %v950_v52 = vadd.f32 %v2071_v40, %v879_v42  ;;  %1469 = vst.msk [vmem:[%s2098_s12 + $0x28] sm:$0xf] %vm1458_vm3, %v1733_v46  ;;  %v982_v54 = vadd.f32 %v2071_v40, %v911_v43  ;;  %v948_v55 = vadd.f32 %v2071_v40, %v877_v45  ;;  %v909_v56 = vmul.f32 %v2066_v38, %v2146_v1  ;;  %v2209_v58 = vpop.f32.mrb[16].mxu1  ;;  %v2211_v59 = vpop.f32.mrb[17].mxu0 }
 0x107   : > { %v882_v57 = vmul.f32 %v1839_v15, %v2066_v38  ;;  %1501 = vst.msk [vmem:[%s2098_s12 + $0xa8] sm:$0xf] %vm1458_vm3, %v1765_v49  ;;  %1467 = vst.msk [vmem:[%s2098_s12 + $0x20] sm:$0xf] %vm1458_vm3, %v1731_v50  ;;  %v1178_v60 = vsel %vm1043_vm8, %v979_v39, %v1114_v51  ;;  %v914_v62 = vmul.f32 %v1871_v19, %v2066_v38  ;;  %v2219_v63 = vpop.f32.mrb[17].mxu1  ;;  %v2221_v0 = vpop.f32.mrb[18].mxu0 }
 0x108   : > { %vm1014_vm9 = vcmp.gt.f32.partialorder %v950_v52, 0.0  ;;  %v1085_v61 = vmul.f32 %v2077_v44, %v950_v52  ;;  %v1763_v1 = vpack.c.bf16 %v1178_v60, %v1178_v60  ;;  %vm1046_vm10 = vcmp.gt.f32.partialorder %v982_v54, 0.0  ;;  %v2224_v3 = vpop.f32.mrb[18].mxu1  ;;  %v2226_v4 = vpop.f32.mrb[19].mxu0 }
 0x109   : > { %v1117_v2 = vmul.f32 %v2077_v44, %v982_v54  ;;  %vm1012_vm11 = vcmp.gt.f32.partialorder %v948_v55, 0.0  ;;  %v1083_v6 = vmul.f32 %v2077_v44, %v948_v55  ;;  %v980_v7 = vadd.f32 %v2071_v40, %v909_v56  ;;  %v2231_v9 = vpop.f32.mrb[19].mxu1 }
 0x10a   : > { %v1149_v5 = vsel %vm1014_vm9, %v950_v52, %v1085_v61  ;;  %v953_v8 = vadd.f32 %v2071_v40, %v882_v57  ;;  %1499 = vst.msk [vmem:[%s2098_s12 + $0xa0] sm:$0xf] %vm1458_vm3, %v1763_v1  ;;  %v985_v12 = vadd.f32 %v2071_v40, %v914_v62  ;;  %v880_v13 = vmul.f32 %v2066_v38, %v2166_v20 }
 0x10b   : > { %v1734_v10 = vpack.c.bf16 %v1149_v5, %v1149_v5  ;;  %v1181_v11 = vsel %vm1046_vm10, %v982_v54, %v1117_v2  ;;  %v1147_v15 = vsel %vm1012_vm11, %v948_v55, %v1083_v6  ;;  %vm1044_vm12 = vcmp.gt.f32.partialorder %v980_v7, 0.0 }
 0x10c   : > { %v1766_v14 = vpack.c.bf16 %v1181_v11, %v1181_v11  ;;  %v1115_v16 = vmul.f32 %v2077_v44, %v980_v7  ;;  %v1732_v17 = vpack.c.bf16 %v1147_v15, %v1147_v15  ;;  %vm1017_vm13 = vcmp.gt.f32.partialorder %v953_v8, 0.0 }
 0x10d   : > { %1470 = vst.msk [vmem:[%s2098_s12 + $0x2c] sm:$0xf] %vm1458_vm3, %v1734_v10  ;;  %v1088_v18 = vmul.f32 %v2077_v44, %v953_v8  ;;  %vm1049_vm14 = vcmp.gt.f32.partialorder %v985_v12, 0.0  ;;  %v1120_v21 = vmul.f32 %v2077_v44, %v985_v12  ;;  %v951_v20 = vadd.f32 %v2071_v40, %v880_v13  ;;  %v2248_v23 = vpop.f32.mrb[20].mxu0 }
 0x10e   : > { %1502 = vst.msk [vmem:[%s2098_s12 + $0xac] sm:$0xf] %vm1458_vm3, %v1766_v14  ;;  %v1179_v19 = vsel %vm1044_vm12, %v980_v7, %v1115_v16  ;;  %v912_v22 = vmul.f32 %v2066_v38, %v2173_v25  ;;  %1468 = vst.msk [vmem:[%s2098_s12 + $0x24] sm:$0xf] %vm1458_vm3, %v1732_v17  ;;  %v883_v28 = vmul.f32 %v2175_v26, %v2066_v38  ;;  %v2256_v32 = vpop.f32.mrb[20].mxu1  ;;  %v2258_v33 = vpop.f32.mrb[21].mxu0 }
 0x10f   : > { %v1764_v24 = vpack.c.bf16 %v1179_v19, %v1179_v19  ;;  %v1152_v27 = vsel %vm1017_vm13, %v953_v8, %v1088_v18  ;;  %v915_v29 = vmul.f32 %v2178_v30, %v2066_v38  ;;  %v1184_v36 = vsel %vm1049_vm14, %v985_v12, %v1120_v21  ;;  %v2261_v37 = vpop.f32.mrb[21].mxu1  ;;  %v2263_v39 = vpop.f32.mrb[22].mxu0 }
 0x110   : > { %v1737_v34 = vpack.c.bf16 %v1152_v27, %v1152_v27  ;;  %vm1015_vm15 = vcmp.gt.f32.partialorder %v951_v20, 0.0  ;;  %v1086_v25 = vmul.f32 %v2077_v44, %v951_v20  ;;  %v1769_v26 = vpack.c.bf16 %v1184_v36, %v1184_v36  ;;  %v2270_v43 = vpop.f32.mrb[22].mxu1  ;;  %v2272_v45 = vpop.f32.mrb[23].mxu0 }
 0x111   : > { %1500 = vst.msk [vmem:[%s2098_s12 + $0xa4] sm:$0xf] %vm1458_vm3, %v1764_v24  ;;  %v983_v30 = vadd.f32 %v2071_v40, %v912_v22  ;;  %v954_v41 = vadd.f32 %v2071_v40, %v883_v28  ;;  %v986_v42 = vadd.f32 %v2071_v40, %v915_v29  ;;  %v881_v47 = vmul.f32 %v2066_v38, %v2180_v31  ;;  %v2282_v50 = vpop.f32.mrb[23].mxu1 }
 0x112   : > { %1473 = vst.msk [vmem:[%s2098_s12 + $0x38] sm:$0xf] %vm1458_vm3, %v1737_v34  ;;  %v1150_v46 = vsel %vm1015_vm15, %v951_v20, %v1086_v25  ;;  %v913_v48 = vmul.f32 %v2066_v38, %v2183_v35  ;;  %v886_v49 = vmul.f32 %v2200_v53, %v2066_v38  ;;  %1505 = vst.msk [vmem:[%s2098_s12 + $0xb8] sm:$0xf] %vm1458_vm3, %v1769_v26 }
 0x113   : > { %v1735_v51 = vpack.c.bf16 %v1150_v46, %v1150_v46  ;;  %vm1047_vm0 = vcmp.gt.f32.partialorder %v983_v30, 0.0  ;;  %v1118_v52 = vmul.f32 %v2077_v44, %v983_v30  ;;  %vm1018_vm1 = vcmp.gt.f32.partialorder %v954_v41, 0.0 }
 0x114   : > { %v1089_v54 = vmul.f32 %v2077_v44, %v954_v41  ;;  %vm1050_vm2 = vcmp.gt.f32.partialorder %v986_v42, 0.0  ;;  %v1121_v31 = vmul.f32 %v2077_v44, %v986_v42  ;;  %v952_v55 = vadd.f32 %v2071_v40, %v881_v47 }
 0x115   : > { %1471 = vst.msk [vmem:[%s2098_s12 + $0x30] sm:$0xf] %vm1458_vm3, %v1735_v51  ;;  %v1182_v35 = vsel %vm1047_vm0, %v983_v30, %v1118_v52  ;;  %v984_v53 = vadd.f32 %v2071_v40, %v913_v48  ;;  %v957_v56 = vadd.f32 %v2071_v40, %v886_v49  ;;  %v918_v57 = vmul.f32 %v2209_v58, %v2066_v38  ;;  %v2296_v1 = vpop.f32.mrb[24].mxu0 }
 0x116   : > { %v1767_v60 = vpack.c.bf16 %v1182_v35, %v1182_v35  ;;  %v1153_v61 = vsel %vm1018_vm1, %v954_v41, %v1089_v54  ;;  %v1185_v62 = vsel %vm1050_vm2, %v986_v42, %v1121_v31  ;;  %vm1016_vm4 = vcmp.gt.f32.partialorder %v952_v55, 0.0  ;;  %v2299_v7 = vpop.f32.mrb[24].mxu1  ;;  %v2301_v8 = vpop.f32.mrb[25].mxu0 }
 0x117   : > { %v1738_v2 = vpack.c.bf16 %v1153_v61, %v1153_v61  ;;  %v1770_v5 = vpack.c.bf16 %v1185_v62, %v1185_v62  ;;  %v1087_v6 = vmul.f32 %v2077_v44, %v952_v55  ;;  %vm1048_vm5 = vcmp.gt.f32.partialorder %v984_v53, 0.0  ;;  %v2308_v12 = vpop.f32.mrb[25].mxu1  ;;  %v2310_v13 = vpop.f32.mrb[26].mxu0 }
 0x118   : > { %1503 = vst.msk [vmem:[%s2098_s12 + $0xb0] sm:$0xf] %vm1458_vm3, %v1767_v60  ;;  %v1119_v58 = vmul.f32 %v2077_v44, %v984_v53  ;;  %vm1021_vm6 = vcmp.gt.f32.partialorder %v957_v56, 0.0  ;;  %v1092_v10 = vmul.f32 %v2077_v44, %v957_v56  ;;  %v989_v11 = vadd.f32 %v2071_v40, %v918_v57  ;;  %v2323_v18 = vpop.f32.mrb[26].mxu1  ;;  %v2325_v19 = vpop.f32.mrb[27].mxu0 }
 0x119   : > { %1474 = vst.msk [vmem:[%s2098_s12 + $0x3c] sm:$0xf] %vm1458_vm3, %v1738_v2  ;;  %1506 = vst.msk [vmem:[%s2098_s12 + $0xbc] sm:$0xf] %vm1458_vm3, %v1770_v5  ;;  %v1151_v14 = vsel %vm1016_vm4, %v952_v55, %v1087_v6  ;;  %v884_v15 = vmul.f32 %v2066_v38, %v2211_v59  ;;  %v916_v16 = vmul.f32 %v2066_v38, %v2219_v63  ;;  %v2328_v24 = vpop.f32.mrb[27].mxu1 }
 0x11a   : > { %v887_v17 = vmul.f32 %v2221_v0, %v2066_v38  ;;  %v1736_v21 = vpack.c.bf16 %v1151_v14, %v1151_v14  ;;  %v1183_v20 = vsel %vm1048_vm5, %v984_v53, %v1119_v58  ;;  %v1156_v22 = vsel %vm1021_vm6, %v957_v56, %v1092_v10 }
 0x11b   : > { %vm1053_vm7 = vcmp.gt.f32.partialorder %v989_v11, 0.0  ;;  %v1768_v59 = vpack.c.bf16 %v1183_v20, %v1183_v20  ;;  %v1741_v27 = vpack.c.bf16 %v1156_v22, %v1156_v22  ;;  %v1124_v63 = vmul.f32 %v2077_v44, %v989_v11 }
 0x11c   : > { %v955_v28 = vadd.f32 %v2071_v40, %v884_v15  ;;  %1472 = vst.msk [vmem:[%s2098_s12 + $0x34] sm:$0xf] %vm1458_vm3, %v1736_v21  ;;  %v987_v0 = vadd.f32 %v2071_v40, %v916_v16  ;;  %v958_v29 = vadd.f32 %v2071_v40, %v887_v17  ;;  %v919_v34 = vmul.f32 %v2224_v3, %v2066_v38 }
 0x11d   : > { %v885_v36 = vmul.f32 %v2066_v38, %v2226_v4  ;;  %1504 = vst.msk [vmem:[%s2098_s12 + $0xb4] sm:$0xf] %vm1458_vm3, %v1768_v59  ;;  %1477 = vst.msk [vmem:[%s2098_s12 + $0x48] sm:$0xf] %vm1458_vm3, %v1741_v27  ;;  %v1188_v25 = vsel %vm1053_vm7, %v989_v11, %v1124_v63  ;;  %v917_v30 = vmul.f32 %v2066_v38, %v2231_v9  ;;  %v2348_v3 = vpop.f32.mrb[28].mxu0 }
 0x11e   : > { %vm1019_vm8 = vcmp.gt.f32.partialorder %v955_v28, 0.0  ;;  %v1090_v26 = vmul.f32 %v2077_v44, %v955_v28  ;;  %v1773_v41 = vpack.c.bf16 %v1188_v25, %v1188_v25  ;;  %vm1051_vm9 = vcmp.gt.f32.partialorder %v987_v0, 0.0  ;;  %v2353_v49 = vpop.f32.mrb[28].mxu1  ;;  %v2355_v51 = vpop.f32.mrb[29].mxu0 }
 0x11f   : > { %v1122_v42 = vmul.f32 %v2077_v44, %v987_v0  ;;  %vm1022_vm10 = vcmp.gt.f32.partialorder %v958_v29, 0.0  ;;  %v1093_v46 = vmul.f32 %v2077_v44, %v958_v29  ;;  %v990_v47 = vadd.f32 %v2071_v40, %v919_v34  ;;  %v2362_v55 = vpop.f32.mrb[29].mxu1  ;;  %v2364_v35 = vpop.f32.mrb[30].mxu0 }
 0x120   : > { %v1154_v4 = vsel %vm1019_vm8, %v955_v28, %v1090_v26  ;;  %v956_v48 = vadd.f32 %v2071_v40, %v885_v36  ;;  %1509 = vst.msk [vmem:[%s2098_s12 + $0xc8] sm:$0xf] %vm1458_vm3, %v1773_v41  ;;  %v988_v54 = vadd.f32 %v2071_v40, %v917_v30  ;;  %v890_v31 = vmul.f32 %v2248_v23, %v2066_v38  ;;  %v2368_v60 = vpop.f32.mrb[30].mxu1  ;;  %v2370_v61 = vpop.f32.mrb[31].mxu0 }
 0x121   : > { %v1739_v9 = vpack.c.bf16 %v1154_v4, %v1154_v4  ;;  %v1186_v52 = vsel %vm1051_vm9, %v987_v0, %v1122_v42  ;;  %v1157_v56 = vsel %vm1022_vm10, %v958_v29, %v1093_v46  ;;  %vm1054_vm11 = vcmp.gt.f32.partialorder %v990_v47, 0.0  ;;  %v2375_v2 = vpop.f32.mrb[31].mxu1 }
 0x122   : > { %v1771_v53 = vpack.c.bf16 %v1186_v52, %v1186_v52  ;;  %v1125_v57 = vmul.f32 %v2077_v44, %v990_v47  ;;  %v1742_v62 = vpack.c.bf16 %v1157_v56, %v1157_v56  ;;  %vm1020_vm12 = vcmp.gt.f32.partialorder %v956_v48, 0.0 }
 0x123   : > { %1475 = vst.msk [vmem:[%s2098_s12 + $0x40] sm:$0xf] %vm1458_vm3, %v1739_v9  ;;  %v1091_v23 = vmul.f32 %v2077_v44, %v956_v48  ;;  %vm1052_vm13 = vcmp.gt.f32.partialorder %v988_v54, 0.0  ;;  %v1123_v6 = vmul.f32 %v2077_v44, %v988_v54  ;;  %v961_v58 = vadd.f32 %v2071_v40, %v890_v31 }
 0x124   : > { %1507 = vst.msk [vmem:[%s2098_s12 + $0xc0] sm:$0xf] %vm1458_vm3, %v1771_v53  ;;  %v1189_v5 = vsel %vm1054_vm11, %v990_v47, %v1125_v57  ;;  %v922_v10 = vmul.f32 %v2256_v32, %v2066_v38  ;;  %1478 = vst.msk [vmem:[%s2098_s12 + $0x4c] sm:$0xf] %vm1458_vm3, %v1742_v62  ;;  %v888_v15 = vmul.f32 %v2066_v38, %v2258_v33 }
 0x125   : > { %v1774_v11 = vpack.c.bf16 %v1189_v5, %v1189_v5  ;;  %v1155_v14 = vsel %vm1020_vm12, %v956_v48, %v1091_v23  ;;  %v920_v16 = vmul.f32 %v2066_v38, %v2261_v37  ;;  %v1187_v21 = vsel %vm1052_vm13, %v988_v54, %v1123_v6 }
 0x126   : > { %v1740_v17 = vpack.c.bf16 %v1155_v14, %v1155_v14  ;;  %vm1025_vm14 = vcmp.gt.f32.partialorder %v961_v58, 0.0  ;;  %v1096_v20 = vmul.f32 %v2077_v44, %v961_v58  ;;  %v1772_v22 = vpack.c.bf16 %v1187_v21, %v1187_v21 }
 0x127   : > { %1510 = vst.msk [vmem:[%s2098_s12 + $0xcc] sm:$0xf] %vm1458_vm3, %v1774_v11  ;;  %v993_v32 = vadd.f32 %v2071_v40, %v922_v10  ;;  %v959_v59 = vadd.f32 %v2071_v40, %v888_v15  ;;  %v991_v27 = vadd.f32 %v2071_v40, %v920_v16  ;;  %v891_v37 = vmul.f32 %v2263_v39, %v2066_v38 }
 0x128   : > { %1476 = vst.msk [vmem:[%s2098_s12 + $0x44] sm:$0xf] %vm1458_vm3, %v1740_v17  ;;  %v1160_v33 = vsel %vm1025_vm14, %v961_v58, %v1096_v20  ;;  %v923_v63 = vmul.f32 %v2270_v43, %v2066_v38  ;;  %v889_v28 = vmul.f32 %v2066_v38, %v2272_v45  ;;  %1508 = vst.msk [vmem:[%s2098_s12 + $0xc4] sm:$0xf] %vm1458_vm3, %v1772_v22 }
 0x129   : > { %v1745_v0 = vpack.c.bf16 %v1160_v33, %v1160_v33  ;;  %vm1057_vm15 = vcmp.gt.f32.partialorder %v993_v32, 0.0  ;;  %v1128_v29 = vmul.f32 %v2077_v44, %v993_v32  ;;  %vm1023_vm0 = vcmp.gt.f32.partialorder %v959_v59, 0.0 }
 0x12a   : > { %v1094_v34 = vmul.f32 %v2077_v44, %v959_v59  ;;  %vm1055_vm1 = vcmp.gt.f32.partialorder %v991_v27, 0.0  ;;  %v1126_v36 = vmul.f32 %v2077_v44, %v991_v27  ;;  %v962_v39 = vadd.f32 %v2071_v40, %v891_v37 }
 0x12b   : > { %1481 = vst.msk [vmem:[%s2098_s12 + $0x58] sm:$0xf] %vm1458_vm3, %v1745_v0  ;;  %v1192_v43 = vsel %vm1057_vm15, %v993_v32, %v1128_v29  ;;  %v994_v45 = vadd.f32 %v2071_v40, %v923_v63  ;;  %v960_v25 = vadd.f32 %v2071_v40, %v889_v28  ;;  %v921_v26 = vmul.f32 %v2066_v38, %v2282_v50 }
 0x12c   : > { %v1777_v30 = vpack.c.bf16 %v1192_v43, %v1192_v43  ;;  %v1158_v41 = vsel %vm1023_vm0, %v959_v59, %v1094_v34  ;;  %v1190_v42 = vsel %vm1055_vm1, %v991_v27, %v1126_v36  ;;  %vm1026_vm2 = vcmp.gt.f32.partialorder %v962_v39, 0.0 }
 0x12d   : > { %v1743_v4 = vpack.c.bf16 %v1158_v41, %v1158_v41  ;;  %v1775_v46 = vpack.c.bf16 %v1190_v42, %v1190_v42  ;;  %v1097_v47 = vmul.f32 %v2077_v44, %v962_v39  ;;  %vm1058_vm4 = vcmp.gt.f32.partialorder %v994_v45, 0.0 }
 0x12e   : > { %1513 = vst.msk [vmem:[%s2098_s12 + $0xd8] sm:$0xf] %vm1458_vm3, %v1777_v30  ;;  %v1129_v48 = vmul.f32 %v2077_v44, %v994_v45  ;;  %vm1024_vm5 = vcmp.gt.f32.partialorder %v960_v25, 0.0  ;;  %v1095_v9 = vmul.f32 %v2077_v44, %v960_v25  ;;  %v992_v52 = vadd.f32 %v2071_v40, %v921_v26 }
 0x12f   : > { %1479 = vst.msk [vmem:[%s2098_s12 + $0x50] sm:$0xf] %vm1458_vm3, %v1743_v4  ;;  %1511 = vst.msk [vmem:[%s2098_s12 + $0xd0] sm:$0xf] %vm1458_vm3, %v1775_v46  ;;  %v1161_v50 = vsel %vm1026_vm2, %v962_v39, %v1097_v47  ;;  %v894_v54 = vmul.f32 %v2296_v1, %v2066_v38  ;;  %v926_v31 = vmul.f32 %v2299_v7, %v2066_v38 }
 0x130   : > { %v892_v53 = vmul.f32 %v2066_v38, %v2301_v8  ;;  %v1746_v56 = vpack.c.bf16 %v1161_v50, %v1161_v50  ;;  %v1193_v57 = vsel %vm1058_vm4, %v994_v45, %v1129_v48  ;;  %v1159_v62 = vsel %vm1024_vm5, %v960_v25, %v1095_v9 }
 0x131   : > { %vm1056_vm6 = vcmp.gt.f32.partialorder %v992_v52, 0.0  ;;  %v1778_v23 = vpack.c.bf16 %v1193_v57, %v1193_v57  ;;  %v1744_v5 = vpack.c.bf16 %v1159_v62, %v1159_v62  ;;  %v1127_v6 = vmul.f32 %v2077_v44, %v992_v52 }
 0x132   : > { %v965_v58 = vadd.f32 %v2071_v40, %v894_v54  ;;  %1482 = vst.msk [vmem:[%s2098_s12 + $0x5c] sm:$0xf] %vm1458_vm3, %v1746_v56  ;;  %v997_v1 = vadd.f32 %v2071_v40, %v926_v31  ;;  %v963_v7 = vadd.f32 %v2071_v40, %v892_v53  ;;  %v924_v10 = vmul.f32 %v2066_v38, %v2308_v12 }
 0x133   : > { %v895_v8 = vmul.f32 %v2310_v13, %v2066_v38  ;;  %1514 = vst.msk [vmem:[%s2098_s12 + $0xdc] sm:$0xf] %vm1458_vm3, %v1778_v23  ;;  %1480 = vst.msk [vmem:[%s2098_s12 + $0x54] sm:$0xf] %vm1458_vm3, %v1744_v5  ;;  %v1191_v11 = vsel %vm1056_vm6, %v992_v52, %v1127_v6  ;;  %v927_v15 = vmul.f32 %v2323_v18, %v2066_v38 }
 0x134   : > { %vm1029_vm7 = vcmp.gt.f32.partialorder %v965_v58, 0.0  ;;  %v1100_v14 = vmul.f32 %v2077_v44, %v965_v58  ;;  %v1776_v16 = vpack.c.bf16 %v1191_v11, %v1191_v11  ;;  %vm1061_vm8 = vcmp.gt.f32.partialorder %v997_v1, 0.0 }
 0x135   : > { %v1132_v12 = vmul.f32 %v2077_v44, %v997_v1  ;;  %vm1027_vm9 = vcmp.gt.f32.partialorder %v963_v7, 0.0  ;;  %v1098_v13 = vmul.f32 %v2077_v44, %v963_v7  ;;  %v995_v21 = vadd.f32 %v2071_v40, %v924_v10 }
 0x136   : > { %v1164_v17 = vsel %vm1029_vm7, %v965_v58, %v1100_v14  ;;  %v966_v20 = vadd.f32 %v2071_v40, %v895_v8  ;;  %1512 = vst.msk [vmem:[%s2098_s12 + $0xd4] sm:$0xf] %vm1458_vm3, %v1776_v16  ;;  %v998_v18 = vadd.f32 %v2071_v40, %v927_v15  ;;  %v893_v59 = vmul.f32 %v2066_v38, %v2325_v19 }
 0x137   : > { %v1749_v22 = vpack.c.bf16 %v1164_v17, %v1164_v17  ;;  %v1196_v32 = vsel %vm1061_vm8, %v997_v1, %v1132_v12  ;;  %v1162_v33 = vsel %vm1027_vm9, %v963_v7, %v1098_v13  ;;  %vm1059_vm10 = vcmp.gt.f32.partialorder %v995_v21, 0.0 }
 0x138   : > { %v1781_v27 = vpack.c.bf16 %v1196_v32, %v1196_v32  ;;  %v1130_v37 = vmul.f32 %v2077_v44, %v995_v21  ;;  %v1747_v63 = vpack.c.bf16 %v1162_v33, %v1162_v33  ;;  %vm1030_vm11 = vcmp.gt.f32.partialorder %v966_v20, 0.0 }
 0x139   : > { %1485 = vst.msk [vmem:[%s2098_s12 + $0x68] sm:$0xf] %vm1458_vm3, %v1749_v22  ;;  %v1101_v28 = vmul.f32 %v2077_v44, %v966_v20  ;;  %vm1062_vm12 = vcmp.gt.f32.partialorder %v998_v18, 0.0  ;;  %v1133_v29 = vmul.f32 %v2077_v44, %v998_v18  ;;  %v964_v19 = vadd.f32 %v2071_v40, %v893_v59 }
 0x13a   : > { %1517 = vst.msk [vmem:[%s2098_s12 + $0xe8] sm:$0xf] %vm1458_vm3, %v1781_v27  ;;  %v1194_v0 = vsel %vm1059_vm10, %v995_v21, %v1130_v37  ;;  %v925_v34 = vmul.f32 %v2066_v38, %v2328_v24  ;;  %1483 = vst.msk [vmem:[%s2098_s12 + $0x60] sm:$0xf] %vm1458_vm3, %v1747_v63  ;;  %v898_v43 = vmul.f32 %v2348_v3, %v2066_v38 }
 0x13b   : > { %v1779_v36 = vpack.c.bf16 %v1194_v0, %v1194_v0  ;;  %v1165_v39 = vsel %vm1030_vm11, %v966_v20, %v1101_v28  ;;  %v930_v45 = vmul.f32 %v2353_v49, %v2066_v38  ;;  %v1197_v26 = vsel %vm1062_vm12, %v998_v18, %v1133_v29 }
 0x13c   : > { %v1750_v25 = vpack.c.bf16 %v1165_v39, %v1165_v39  ;;  %vm1028_vm13 = vcmp.gt.f32.partialorder %v964_v19, 0.0  ;;  %v1099_v30 = vmul.f32 %v2077_v44, %v964_v19  ;;  %v1782_v41 = vpack.c.bf16 %v1197_v26, %v1197_v26 }
 0x13d   : > { %1515 = vst.msk [vmem:[%s2098_s12 + $0xe0] sm:$0xf] %vm1458_vm3, %v1779_v36  ;;  %v996_v24 = vadd.f32 %v2071_v40, %v925_v34  ;;  %v969_v42 = vadd.f32 %v2071_v40, %v898_v43  ;;  %v1001_v4 = vadd.f32 %v2071_v40, %v930_v45  ;;  %v896_v49 = vmul.f32 %v2066_v38, %v2355_v51 }
 0x13e   : > { %1486 = vst.msk [vmem:[%s2098_s12 + $0x6c] sm:$0xf] %vm1458_vm3, %v1750_v25  ;;  %v1163_v3 = vsel %vm1028_vm13, %v964_v19, %v1099_v30  ;;  %v928_v46 = vmul.f32 %v2066_v38, %v2362_v55  ;;  %v899_v47 = vmul.f32 %v2364_v35, %v2066_v38  ;;  %1518 = vst.msk [vmem:[%s2098_s12 + $0xec] sm:$0xf] %vm1458_vm3, %v1782_v41 }
 0x13f   : > { %v1748_v48 = vpack.c.bf16 %v1163_v3, %v1163_v3  ;;  %vm1060_vm14 = vcmp.gt.f32.partialorder %v996_v24, 0.0  ;;  %v1131_v9 = vmul.f32 %v2077_v44, %v996_v24  ;;  %vm1033_vm15 = vcmp.gt.f32.partialorder %v969_v42, 0.0 }
 0x140   : > { %v1104_v52 = vmul.f32 %v2077_v44, %v969_v42  ;;  %vm1065_vm0 = vcmp.gt.f32.partialorder %v1001_v4, 0.0  ;;  %v1136_v50 = vmul.f32 %v2077_v44, %v1001_v4  ;;  %v967_v51 = vadd.f32 %v2071_v40, %v896_v49 }
 0x141   : > { %1484 = vst.msk [vmem:[%s2098_s12 + $0x64] sm:$0xf] %vm1458_vm3, %v1748_v48  ;;  %v1195_v55 = vsel %vm1060_vm14, %v996_v24, %v1131_v9  ;;  %v999_v35 = vadd.f32 %v2071_v40, %v928_v46  ;;  %v970_v54 = vadd.f32 %v2071_v40, %v899_v47  ;;  %v931_v31 = vmul.f32 %v2368_v60, %v2066_v38 }
 0x142   : > { %v1780_v53 = vpack.c.bf16 %v1195_v55, %v1195_v55  ;;  %v1168_v56 = vsel %vm1033_vm15, %v969_v42, %v1104_v52  ;;  %v1200_v57 = vsel %vm1065_vm0, %v1001_v4, %v1136_v50  ;;  %vm1031_vm1 = vcmp.gt.f32.partialorder %v967_v51, 0.0 }
 0x143   : > { %v1753_v62 = vpack.c.bf16 %v1168_v56, %v1168_v56  ;;  %v1785_v23 = vpack.c.bf16 %v1200_v57, %v1200_v57  ;;  %v1102_v5 = vmul.f32 %v2077_v44, %v967_v51  ;;  %vm1063_vm2 = vcmp.gt.f32.partialorder %v999_v35, 0.0 }
 0x144   : > { %1516 = vst.msk [vmem:[%s2098_s12 + $0xe4] sm:$0xf] %vm1458_vm3, %v1780_v53  ;;  %v1134_v6 = vmul.f32 %v2077_v44, %v999_v35  ;;  %vm1034_vm4 = vcmp.gt.f32.partialorder %v970_v54, 0.0  ;;  %v1105_v58 = vmul.f32 %v2077_v44, %v970_v54  ;;  %v1002_v1 = vadd.f32 %v2071_v40, %v931_v31 }
 0x145   : > { %1489 = vst.msk [vmem:[%s2098_s12 + $0x78] sm:$0xf] %vm1458_vm3, %v1753_v62  ;;  %1521 = vst.msk [vmem:[%s2098_s12 + $0xf8] sm:$0xf] %vm1458_vm3, %v1785_v23  ;;  %v1166_v60 = vsel %vm1031_vm1, %v967_v51, %v1102_v5  ;;  %v897_v7 = vmul.f32 %v2066_v38, %v2370_v61  ;;  %v929_v10 = vmul.f32 %v2066_v38, %v2375_v2 }
 0x146   : > { %v1751_v8 = vpack.c.bf16 %v1166_v60, %v1166_v60  ;;  %v1198_v11 = vsel %vm1063_vm2, %v999_v35, %v1134_v6  ;;  %v1169_v14 = vsel %vm1034_vm4, %v970_v54, %v1105_v58  ;;  %vm1066_vm5 = vcmp.gt.f32.partialorder %v1002_v1, 0.0 }
 0x147   : > { %v1783_v15 = vpack.c.bf16 %v1198_v11, %v1198_v11  ;;  %v1754_v16 = vpack.c.bf16 %v1169_v14, %v1169_v14  ;;  %v1137_v12 = vmul.f32 %v2077_v44, %v1002_v1  ;;  %v968_v17 = vadd.f32 %v2071_v40, %v897_v7 }
 0x148   : > { %1487 = vst.msk [vmem:[%s2098_s12 + $0x70] sm:$0xf] %vm1458_vm3, %v1751_v8  ;;  %v1000_v61 = vadd.f32 %v2071_v40, %v929_v10 }
 0x149   : > { %1519 = vst.msk [vmem:[%s2098_s12 + $0xf0] sm:$0xf] %vm1458_vm3, %v1783_v15  ;;  %1490 = vst.msk [vmem:[%s2098_s12 + $0x7c] sm:$0xf] %vm1458_vm3, %v1754_v16  ;;  %v1201_v38 = vsel %vm1066_vm5, %v1002_v1, %v1137_v12  ;;  %vm1032_vm6 = vcmp.gt.f32.partialorder %v968_v17, 0.0  ;;  %v1103_v2 = vmul.f32 %v2077_v44, %v968_v17 }
 0x14a   : > { %v1786_v13 = vpack.c.bf16 %v1201_v38, %v1201_v38  ;;  %vm1064_vm7 = vcmp.gt.f32.partialorder %v1000_v61, 0.0  ;;  %v1135_v21 = vmul.f32 %v2077_v44, %v1000_v61 }
 0x14b   : > { %v1167_v20 = vsel %vm1032_vm6, %v968_v17, %v1103_v2 }
 0x14c   : > { %1522 = vst.msk [vmem:[%s2098_s12 + $0xfc] sm:$0xf] %vm1458_vm3, %v1786_v13  ;;  %v1752_v22 = vpack.c.bf16 %v1167_v20, %v1167_v20  ;;  %v1199_v32 = vsel %vm1064_vm7, %v1000_v61, %v1135_v21 }
 0x14d   : > { %v1784_v18 = vpack.c.bf16 %v1199_v32, %v1199_v32 }
 0x14e   : > { %1488 = vst.msk [vmem:[%s2098_s12 + $0x74] sm:$0xf] %vm1458_vm3, %v1752_v22 }
 0x14f   : > { %1520 = vst.msk [vmem:[%s2098_s12 + $0xf4] sm:$0xf] %vm1458_vm3, %v1784_v18 }
 0x150 PF: > { %s15_s18 = sadd.s32 1, %s1942_s18  }
 0x151   : > { %p12_p4 = scmp.ge.s32.totalorder %s15_s18, 6  }
 0x153   :  { %14 = sbr.rel (!%p12_p4) target bundleno = 1 (0x1), region = 70 }

</bundles_post_ra>
